<compile_context>
chip_gen: v5e
topology: v5e:2x2
jax: 0.10.0
libtpu: 0.0.40
codegen_flags: <defaults>
</compile_context>

<pallas_src>
import functools

import jax
import jax.numpy as jnp
from jax.experimental import pallas as pl
from jax.experimental.pallas import tpu as pltpu

VOCAB = 16      # input_size (vocabulary)
EMB = 64        # config.EMBEDDING_VEC_SIZE
HIDDEN = 128    # hidden_size (2*EMB == HIDDEN, as the module's self-feeding loop
                # implicitly requires for n_layers > 1)
N_LAYERS = 1


# ----------------------------- Pallas kernel --------------------------------
def _encoder_gru_seq_kernel(ids_ref,                       # (T, 2) i32  SMEM (scalar prefetch)
                            ew_w_ref, ew_d_ref,            # (V, 3H) f32 VMEM (emb @ Wi_half^T)
                            wi_ref, wh_ref,                # (2E,3H)/(H,3H) bf16 VMEM
                            bih_ref, bhh_ref,              # (1, 3H) f32 VMEM
                            h0_ref,                        # (1, H)  f32 VMEM
                            out_ref,                       # (1, 1, H) f32 VMEM (block t)
                            h_scr,                         # (1, H)  f32 VMEM scratch (carry)
                            *, n_layers, vocab):
    """One grid step == one (word_token, dep_parse) pair -> n_layers GRU updates."""
    H = h_scr.shape[-1]
    t = pl.program_id(0)

    @pl.when(t == 0)
    def _():
        h_scr[...] = h0_ref[...]

    # Clamp ids: dynamic VMEM slices have no runtime bounds check.
    wid = jnp.clip(ids_ref[t, 0], 0, vocab - 1)
    did = jnp.clip(ids_ref[t, 1], 0, vocab - 1)

    bih = bih_ref[...]                                   # (1, 3H) f32
    bhh = bhh_ref[...]                                   # (1, 3H) f32
    h = h_scr[...]                                       # (1, H)  f32

    # Layer 0: input-gate contribution from the precomputed (embedding @ Wi^T)
    # tables -> two sublane gathers + VPU adds (no x@Wi matmul, no lane concat).
    gi = ew_w_ref[pl.ds(wid, 1), :] + ew_d_ref[pl.ds(did, 1), :] + bih   # (1, 3H) f32

    for layer in range(n_layers):
        if layer > 0:
            # Original module feeds the output back in with the SAME GRU weights
            # (not a stacked torch.nn.GRU(num_layers=k)).
            gi = jnp.dot(h.astype(jnp.bfloat16), wi_ref[...],
                         preferred_element_type=jnp.float32) + bih
        gh = jnp.dot(h.astype(jnp.bfloat16), wh_ref[...],
                     preferred_element_type=jnp.float32) + bhh           # (1, 3H) f32
        # Gate columns are 128-lane aligned: [0:H]=r, [H:2H]=z, [2H:3H]=n.
        r = jax.nn.sigmoid(gi[:, 0:H] + gh[:, 0:H])
        z = jax.nn.sigmoid(gi[:, H:2 * H] + gh[:, H:2 * H])
        n = jnp.tanh(gi[:, 2 * H:3 * H] + r * gh[:, 2 * H:3 * H])
        h = (1.0 - z) * n + z * h

    h_scr[...] = h
    out_ref[...] = h.reshape(out_ref.shape).astype(out_ref.dtype)


def encoder_gru_seq_pallas(ids, ew_word, ew_dep, wi_bf16, wh_bf16,
                           b_ih, b_hh, h0, *, n_layers, vocab):
    """ids:(T,2) i32 -> (T,H) f32 per-step hidden states (one fused pallas_call)."""
    T = ids.shape[0]
    V, G = ew_word.shape          # G = 3H
    E2 = wi_bf16.shape[0]
    H = h0.shape[-1]
    kernel = functools.partial(_encoder_gru_seq_kernel, n_layers=n_layers, vocab=vocab)
    const = lambda t, ids: (0, 0)         # constant index_map -> DMA'd once, stays resident
    out = pl.pallas_call(
        kernel,
        out_shape=jax.ShapeDtypeStruct((T, 1, H), jnp.float32),
        grid_spec=pltpu.PrefetchScalarGridSpec(
            num_scalar_prefetch=1,            # ids -> SMEM, available to index_maps
            grid=(T,),
            in_specs=[
                pl.BlockSpec((V, G), const),      # ew_word  (f32)
                pl.BlockSpec((V, G), const),      # ew_dep   (f32)
                pl.BlockSpec((E2, G), const),     # Wi^T     (bf16, layers > 0 only)
                pl.BlockSpec((H, G), const),      # Wh^T     (bf16)
                pl.BlockSpec((1, G), const),      # b_ih
                pl.BlockSpec((1, G), const),      # b_hh
                pl.BlockSpec((1, H), const),      # h0
            ],
            out_specs=pl.BlockSpec((1, 1, H), lambda t, ids: (t, 0, 0)),
            scratch_shapes=[pltpu.VMEM((1, H), jnp.float32)],   # hidden-state carry
        ),
        compiler_params=pltpu.CompilerParams(
            dimension_semantics=("arbitrary",)),   # sequential carry across tokens
    )(ids, ew_word, ew_dep, wi_bf16, wh_bf16, b_ih, b_hh, h0)
    return out.reshape(T, H)


# ------------------------- pure-JAX reference (check) ------------------------
def _gru_cell_ref(x, h, w_ih, w_hh, b_ih, b_hh, *, exact_gi):
    """torch-style GRU step with the same rounding as the kernel:
    layer-0 gi in f32 (EW tables), bf16 operands for every MXU matmul."""
    H = h.shape[-1]
    if exact_gi:
        gi = x @ w_ih.T + b_ih
    else:
        gi = (x.astype(jnp.bfloat16).astype(jnp.float32)
              @ w_ih.T.astype(jnp.bfloat16).astype(jnp.float32)) + b_ih
    gh = (h.astype(jnp.bfloat16).astype(jnp.float32)
          @ w_hh.T.astype(jnp.bfloat16).astype(jnp.float32)) + b_hh
    r = jax.nn.sigmoid(gi[:, 0:H] + gh[:, 0:H])
    z = jax.nn.sigmoid(gi[:, H:2 * H] + gh[:, H:2 * H])
    n = jnp.tanh(gi[:, 2 * H:3 * H] + r * gh[:, 2 * H:3 * H])
    return (1.0 - z) * n + z * h


def _ref_encoder_step(enc, wid, did, h):
    x = jnp.concatenate([enc.embedding[wid], enc.embedding[did]]).reshape(1, -1)
    for layer in range(enc.n_layers):
        h = _gru_cell_ref(x, h, enc.w_ih, enc.w_hh, enc.b_ih, enc.b_hh,
                          exact_gi=(layer == 0))
        x = h
    return h


# ------------------------------- module port ---------------------------------
class EncoderRNN:
    def __init__(self, input_size, hidden_size, n_layers=1, key=None):
        self.n_layers = n_layers
        self.hidden_size = hidden_size
        self.vocab = input_size
        H = hidden_size
        E2 = 2 * EMB
        k1, k2, k3, k4, k5 = jax.random.split(key, 5)
        bound = 1.0 / float(jnp.sqrt(jnp.float32(H)))
        # nn.Embedding(input_size, EMB): N(0, 1) init.
        self.embedding = jax.random.normal(k1, (input_size, EMB), jnp.float32)
        # nn.GRU(2*EMB, H): uniform(-1/sqrt(H), 1/sqrt(H)) init, gate rows [r|z|n].
        self.w_ih = jax.random.uniform(k2, (3 * H, E2), jnp.float32, -bound, bound)
        self.w_hh = jax.random.uniform(k3, (3 * H, H), jnp.float32, -bound, bound)
        self.b_ih = jax.random.uniform(k4, (3 * H,), jnp.float32, -bound, bound)
        self.b_hh = jax.random.uniform(k5, (3 * H,), jnp.float32, -bound, bound)

        # ---- kernel-side packing (plain JAX glue, done once per model) ----
        # Layer-0 input gates: (embedding @ Wi_half^T) tables, f32, (V, 3H) each.
        self.ew_word = self.embedding @ self.w_ih[:, :EMB].T
        self.ew_dep = self.embedding @ self.w_ih[:, EMB:].T
        # Gate matrices transposed to (K, 3H), cols [r|z|n], bf16 for the MXU.
        self.wi_packed = self.w_ih.T.astype(jnp.bfloat16)   # (2E, 3H), layers > 0 only
        self.wh_packed = self.w_hh.T.astype(jnp.bfloat16)   # (H, 3H)
        self.b_ih2d = self.b_ih.reshape(1, -1)
        self.b_hh2d = self.b_hh.reshape(1, -1)

    def forward(self, inputs, hidden):
        # inputs = (word_token_ids, dep_parse_ids), each a length-1 int array,
        # mirroring the `len(input[i]) == 1` embedding path of the PyTorch code.
        # TODO(synk): the try/except zero-vector fallback and the "already embedded"
        # (len != 1) branch are host-side control flow and are not reproduced.
        word_ids, dep_ids = inputs
        ids = jnp.stack([word_ids[:1], dep_ids[:1]], axis=1).astype(jnp.int32)   # (1, 2)
        outs = encoder_gru_seq_pallas(
            ids, self.ew_word, self.ew_dep, self.wi_packed, self.wh_packed,
            self.b_ih2d, self.b_hh2d, hidden.reshape(1, self.hidden_size),
            n_layers=self.n_layers, vocab=self.vocab)
        h_new = outs[-1].reshape(1, 1, -1)
        return h_new, h_new

    def forward_sequence(self, word_seq, dep_seq, hidden):
        """Fused path: T (word, dep) token pairs through T GRU steps in ONE
        pallas_call (ids scalar-prefetched, weights DMA'd once, h carried in VMEM)."""
        ids = jnp.stack([word_seq, dep_seq], axis=1).astype(jnp.int32)           # (T, 2)
        outs = encoder_gru_seq_pallas(
            ids, self.ew_word, self.ew_dep, self.wi_packed, self.wh_packed,
            self.b_ih2d, self.b_hh2d, hidden.reshape(1, self.hidden_size),
            n_layers=self.n_layers, vocab=self.vocab)
        return outs, outs[-1].reshape(1, 1, -1)

    def init_hidden(self, key):
        # torch weight_init.xavier_normal on (1, 1, H): fan_in = fan_out = H.
        std = 1.0 / float(jnp.sqrt(jnp.float32(self.hidden_size)))
        return std * jax.random.normal(key, (1, 1, self.hidden_size), jnp.float32)


# ----------------------------------- main ------------------------------------
if __name__ == "__main__":
    key = jax.random.PRNGKey(0)
    k_param, k_hidden, k_w, k_d = jax.random.split(key, 4)

    enc = EncoderRNN(VOCAB, HIDDEN, n_layers=N_LAYERS, key=k_param)
    hidden0 = enc.init_hidden(k_hidden)                                    # (1, 1, H)

    # (a) single-step forward -- original module call semantics.
    word_ids = jnp.array([3], dtype=jnp.int32)
    dep_ids = jnp.array([7], dtype=jnp.int32)
    output, hidden = enc.forward((word_ids, dep_ids), hidden0)
    jax.block_until_ready((output, hidden))

    h_ref = _ref_encoder_step(enc, 3, 7, hidden0.reshape(1, -1))
    assert output.shape == (1, 1, HIDDEN) and hidden.shape == (1, 1, HIDDEN)
    err_step = float(jnp.max(jnp.abs(hidden.reshape(1, -1) - h_ref)))
    assert err_step < 2e-3, err_step
    assert bool(jnp.allclose(output, hidden))

    # (b) fused sequence -- T token pairs in one pallas_call.
    T = 8
    word_seq = jax.random.randint(k_w, (T,), 0, VOCAB, dtype=jnp.int32)
    dep_seq = jax.random.randint(k_d, (T,), 0, VOCAB, dtype=jnp.int32)
    outs, h_last = enc.forward_sequence(word_seq, dep_seq, hidden0)
    jax.block_until_ready((outs, h_last))

    h_r = hidden0.reshape(1, -1)
    refs = []
    for t in range(T):
        h_r = _ref_encoder_step(enc, int(word_seq[t]), int(dep_seq[t]), h_r)
        refs.append(h_r)
    refs = jnp.concatenate(refs, axis=0)                                    # (T, H)
    assert outs.shape == (T, HIDDEN), outs.shape
    err_seq = float(jnp.max(jnp.abs(outs - refs)))
    assert err_seq < 2e-3, err_seq
    assert bool(jnp.array_equal(h_last.reshape(1, -1), outs[-1:]))

    print("KERNEL_OK")
</pallas_src>

<mosaic_0001>
module attributes {stable_mosaic.version = 11 : i64} {
  func.func @_encoder_gru_seq_kernel(%arg0: i32, %arg1: memref<1x2xi32, #tpu.memory_space<smem>>, %arg2: memref<16x384xf32, #tpu.memory_space<vmem>>, %arg3: memref<16x384xf32, #tpu.memory_space<vmem>>, %arg4: memref<128x384xbf16, #tpu.memory_space<vmem>>, %arg5: memref<128x384xbf16, #tpu.memory_space<vmem>>, %arg6: memref<1x384xf32, #tpu.memory_space<vmem>>, %arg7: memref<1x384xf32, #tpu.memory_space<vmem>>, %arg8: memref<1x128xf32, #tpu.memory_space<vmem>>, %arg9: memref<1x1x128xf32, #tpu.memory_space<vmem>>, %arg10: memref<1x128xf32, #tpu.memory_space<vmem>>) attributes {dimension_semantics = [#tpu.dimension_semantics<arbitrary>], iteration_bounds = array<i64: 1>, scalar_prefetch = 1 : i64, scratch_operands = 1 : i64, tpu.core_type = #tpu.core_type<tc>, window_params = [{pipeline_mode = #tpu.pipeline_mode<synchronous>, transform_indices = @transform_0, window_bounds = array<i64: 16, 384>}, {pipeline_mode = #tpu.pipeline_mode<synchronous>, transform_indices = @transform_1, window_bounds = array<i64: 16, 384>}, {pipeline_mode = #tpu.pipeline_mode<synchronous>, transform_indices = @transform_2, window_bounds = array<i64: 128, 384>}, {pipeline_mode = #tpu.pipeline_mode<synchronous>, transform_indices = @transform_3, window_bounds = array<i64: 128, 384>}, {pipeline_mode = #tpu.pipeline_mode<synchronous>, transform_indices = @transform_4, window_bounds = array<i64: 1, 384>}, {pipeline_mode = #tpu.pipeline_mode<synchronous>, transform_indices = @transform_5, window_bounds = array<i64: 1, 384>}, {pipeline_mode = #tpu.pipeline_mode<synchronous>, transform_indices = @transform_6, window_bounds = array<i64: 1, 128>}, {transform_indices = @transform_7, window_bounds = array<i64: 1, 1, 128>}]} {
    %c0_i32 = arith.constant 0 : i32
    %0 = arith.cmpi eq, %arg0, %c0_i32 : i32
    %1 = arith.extui %0 : i1 to i32
    %c0_i32_0 = arith.constant 0 : i32
    %2 = arith.cmpi ne, %1, %c0_i32_0 : i32
    scf.if %2 {
      %c0_22 = arith.constant 0 : index
      %c0_23 = arith.constant 0 : index
      %53 = vector.load %arg8[%c0_22, %c0_23] : memref<1x128xf32, #tpu.memory_space<vmem>>, vector<1x128xf32>
      %c0_24 = arith.constant 0 : index
      %c0_25 = arith.constant 0 : index
      %54 = vector.load %arg10[%c0_24, %c0_25] : memref<1x128xf32, #tpu.memory_space<vmem>>, vector<1x128xf32>
      tpu.vector_store %arg10[%c0_24, %c0_25], %53 {strides = array<i32>} : memref<1x128xf32, #tpu.memory_space<vmem>>, vector<1x128xf32>,
    } else {
    }
    %3 = arith.index_cast %arg0 : i32 to index
    %c0 = arith.constant 0 : index
    %4 = memref.load %arg1[%3, %c0] : memref<1x2xi32, #tpu.memory_space<smem>>
    %c0_i32_1 = arith.constant 0 : i32
    %c15_i32 = arith.constant 15 : i32
    %5 = arith.maxsi %c0_i32_1, %4 : i32
    %6 = arith.minsi %c15_i32, %5 : i32
    %7 = arith.index_cast %arg0 : i32 to index
    %c1 = arith.constant 1 : index
    %8 = memref.load %arg1[%7, %c1] : memref<1x2xi32, #tpu.memory_space<smem>>
    %c0_i32_2 = arith.constant 0 : i32
    %c15_i32_3 = arith.constant 15 : i32
    %9 = arith.maxsi %c0_i32_2, %8 : i32
    %10 = arith.minsi %c15_i32_3, %9 : i32
    %c0_4 = arith.constant 0 : index
    %c0_5 = arith.constant 0 : index
    %11 = vector.load %arg6[%c0_4, %c0_5] : memref<1x384xf32, #tpu.memory_space<vmem>>, vector<1x384xf32>
    %c0_6 = arith.constant 0 : index
    %c0_7 = arith.constant 0 : index
    %12 = vector.load %arg7[%c0_6, %c0_7] : memref<1x384xf32, #tpu.memory_space<vmem>>, vector<1x384xf32>
    %c0_8 = arith.constant 0 : index
    %c0_9 = arith.constant 0 : index
    %13 = vector.load %arg10[%c0_8, %c0_9] : memref<1x128xf32, #tpu.memory_space<vmem>>, vector<1x128xf32>
    %14 = arith.index_cast %6 : i32 to index
    %c0_10 = arith.constant 0 : index
    %15 = vector.load %arg2[%14, %c0_10] : memref<16x384xf32, #tpu.memory_space<vmem>>, vector<1x384xf32>
    %16 = arith.index_cast %10 : i32 to index
    %c0_11 = arith.constant 0 : index
    %17 = vector.load %arg3[%16, %c0_11] : memref<16x384xf32, #tpu.memory_space<vmem>>, vector<1x384xf32>
    %18 = arith.addf %15, %17 : vector<1x384xf32>
    %19 = arith.addf %18, %11 : vector<1x384xf32>
    %20 = arith.truncf %13 : vector<1x128xf32> to vector<1x128xbf16>
    %c0_12 = arith.constant 0 : index
    %c0_13 = arith.constant 0 : index
    %21 = vector.load %arg5[%c0_12, %c0_13] : memref<128x384xbf16, #tpu.memory_space<vmem>>, vector<128x384xbf16>
    %cst = arith.constant dense<0.000000e+00> : vector<1x384xf32>
    %22 = tpu.matmul %20, %21, %cst {dimension_numbers = #tpu.dot_dimension_numbers<[1], [0], [0], [1], [0, 0, 1, 1], [], []>} : vector<1x128xbf16>, vector<128x384xbf16>, vector<1x384xf32> -> vector<1x384xf32>
    %23 = arith.addf %22, %12 : vector<1x384xf32>
    %24 = vector.extract_strided_slice %19 {offsets = [0, 0], sizes = [1, 128], strides = [1, 1]} : vector<1x384xf32> to vector<1x128xf32>
    %25 = vector.extract_strided_slice %23 {offsets = [0, 0], sizes = [1, 128], strides = [1, 1]} : vector<1x384xf32> to vector<1x128xf32>
    %26 = arith.addf %24, %25 : vector<1x128xf32>
    %27 = arith.negf %26 : vector<1x128xf32>
    %28 = math.exp %27 : vector<1x128xf32>
    %cst_14 = arith.constant 1.000000e+00 : f32
    %29 = vector.broadcast %cst_14 : f32 to vector<1x128xf32>
    %30 = arith.addf %29, %28 : vector<1x128xf32>
    %31 = arith.divf %29, %30 : vector<1x128xf32>
    %32 = vector.extract_strided_slice %19 {offsets = [0, 128], sizes = [1, 128], strides = [1, 1]} : vector<1x384xf32> to vector<1x128xf32>
    %33 = vector.extract_strided_slice %23 {offsets = [0, 128], sizes = [1, 128], strides = [1, 1]} : vector<1x384xf32> to vector<1x128xf32>
    %34 = arith.addf %32, %33 : vector<1x128xf32>
    %35 = arith.negf %34 : vector<1x128xf32>
    %36 = math.exp %35 : vector<1x128xf32>
    %cst_15 = arith.constant 1.000000e+00 : f32
    %37 = vector.broadcast %cst_15 : f32 to vector<1x128xf32>
    %38 = arith.addf %37, %36 : vector<1x128xf32>
    %39 = arith.divf %37, %38 : vector<1x128xf32>
    %40 = vector.extract_strided_slice %19 {offsets = [0, 256], sizes = [1, 128], strides = [1, 1]} : vector<1x384xf32> to vector<1x128xf32>
    %41 = vector.extract_strided_slice %23 {offsets = [0, 256], sizes = [1, 128], strides = [1, 1]} : vector<1x384xf32> to vector<1x128xf32>
    %42 = arith.mulf %31, %41 : vector<1x128xf32>
    %43 = arith.addf %40, %42 : vector<1x128xf32>
    %44 = math.tanh %43 : vector<1x128xf32>
    %cst_16 = arith.constant 1.000000e+00 : f32
    %45 = vector.broadcast %cst_16 : f32 to vector<1x128xf32>
    %46 = arith.subf %45, %39 : vector<1x128xf32>
    %47 = arith.mulf %46, %44 : vector<1x128xf32>
    %48 = arith.mulf %39, %13 : vector<1x128xf32>
    %49 = arith.addf %47, %48 : vector<1x128xf32>
    %c0_17 = arith.constant 0 : index
    %c0_18 = arith.constant 0 : index
    %50 = vector.load %arg10[%c0_17, %c0_18] : memref<1x128xf32, #tpu.memory_space<vmem>>, vector<1x128xf32>
    tpu.vector_store %arg10[%c0_17, %c0_18], %49 {strides = array<i32>} : memref<1x128xf32, #tpu.memory_space<vmem>>, vector<1x128xf32>,
    %51 = vector.shape_cast %49 : vector<1x128xf32> to vector<1x1x128xf32>
    %c0_19 = arith.constant 0 : index
    %c0_20 = arith.constant 0 : index
    %c0_21 = arith.constant 0 : index
    %52 = vector.load %arg9[%c0_19, %c0_20, %c0_21] : memref<1x1x128xf32, #tpu.memory_space<vmem>>, vector<1x1x128xf32>
    tpu.vector_store %arg9[%c0_19, %c0_20, %c0_21], %51 {strides = array<i32>} : memref<1x1x128xf32, #tpu.memory_space<vmem>>, vector<1x1x128xf32>,
    return
  }
  func.func @transform_0(%arg0: i32, %arg1: memref<1x2xi32, #tpu.memory_space<smem>>) -> (i32, i32) {
    %c0_i32 = arith.constant 0 : i32
    %c0_i32_0 = arith.constant 0 : i32
    %c0_i32_1 = arith.constant 0 : i32
    return %c0_i32, %c0_i32_0 : i32, i32
  }
  func.func @transform_1(%arg0: i32, %arg1: memref<1x2xi32, #tpu.memory_space<smem>>) -> (i32, i32) {
    %c0_i32 = arith.constant 0 : i32
    %c0_i32_0 = arith.constant 0 : i32
    %c0_i32_1 = arith.constant 0 : i32
    return %c0_i32, %c0_i32_0 : i32, i32
  }
  func.func @transform_2(%arg0: i32, %arg1: memref<1x2xi32, #tpu.memory_space<smem>>) -> (i32, i32) {
    %c0_i32 = arith.constant 0 : i32
    %c0_i32_0 = arith.constant 0 : i32
    %c0_i32_1 = arith.constant 0 : i32
    return %c0_i32, %c0_i32_0 : i32, i32
  }
  func.func @transform_3(%arg0: i32, %arg1: memref<1x2xi32, #tpu.memory_space<smem>>) -> (i32, i32) {
    %c0_i32 = arith.constant 0 : i32
    %c0_i32_0 = arith.constant 0 : i32
    %c0_i32_1 = arith.constant 0 : i32
    return %c0_i32, %c0_i32_0 : i32, i32
  }
  func.func @transform_4(%arg0: i32, %arg1: memref<1x2xi32, #tpu.memory_space<smem>>) -> (i32, i32) {
    %c0_i32 = arith.constant 0 : i32
    %c0_i32_0 = arith.constant 0 : i32
    %c0_i32_1 = arith.constant 0 : i32
    return %c0_i32, %c0_i32_0 : i32, i32
  }
  func.func @transform_5(%arg0: i32, %arg1: memref<1x2xi32, #tpu.memory_space<smem>>) -> (i32, i32) {
    %c0_i32 = arith.constant 0 : i32
    %c0_i32_0 = arith.constant 0 : i32
    %c0_i32_1 = arith.constant 0 : i32
    return %c0_i32, %c0_i32_0 : i32, i32
  }
  func.func @transform_6(%arg0: i32, %arg1: memref<1x2xi32, #tpu.memory_space<smem>>) -> (i32, i32) {
    %c0_i32 = arith.constant 0 : i32
    %c0_i32_0 = arith.constant 0 : i32
    %c0_i32_1 = arith.constant 0 : i32
    return %c0_i32, %c0_i32_0 : i32, i32
  }
  func.func @transform_7(%arg0: i32, %arg1: memref<1x2xi32, #tpu.memory_space<smem>>) -> (i32, i32, i32) {
    %c0_i32 = arith.constant 0 : i32
    %c0_i32_0 = arith.constant 0 : i32
    %c0_i32_1 = arith.constant 0 : i32
    return %arg0, %c0_i32, %c0_i32_0 : i32, i32, i32
  }
}

</mosaic_0001>

<bundles_post_ra>
// kernel: tpu_custom_call.1
= control target key start
LH: loop header
LB: loop body
LE: loop exit
PB: predicated region body
PF: predicated region fallthrough
CT: control target
= control target key end

     0   :  { %s765_s30 = smov [#allocation4]   ;;  %s853_s0 = inlined_call_operand.hbm [shape: s32[1,2], index: 0, kind: input, shape index: {}]   ;;  %s854_s1 = inlined_call_operand.hbm [shape: f32[16,384], index: 1, kind: input, shape index: {}]   ;;  %s855_s2 = inlined_call_operand.hbm [shape: f32[16,384], index: 2, kind: input, shape index: {}]   ;;  %s856_s3 = inlined_call_operand.hbm [shape: bf16[128,384], index: 3, kind: input, shape index: {}]   ;;  %s857_s4 = inlined_call_operand.hbm [shape: bf16[128,384], index: 4, kind: input, shape index: {}]   ;;  %s858_s5 = inlined_call_operand.vmem [shape: f32[1,384], index: 5, kind: input, shape index: {}]   ;;  %s859_s6 = inlined_call_operand.hbm [shape: f32[1,384], index: 6, kind: input, shape index: {}]   ;;  %s860_s7 = inlined_call_operand.vmem [shape: f32[1,128], index: 7, kind: input, shape index: {}]   ;;  %s861_s8 = inlined_call_operand.hbm [shape: f32[1,1,128], index: 8, kind: output, shape index: {}]  }
   0x1   :  { %s14_s29 = sshll.u32 %s853_s0, 4  ;;  %s15_s29 = int_to_ptr.hbm [resolvable:$true] %s14_s29 }
   0x2   :  { %17 = dma.hbm_to_smem %s15_s29, 16, %s765_s30, [#allocation3] }
   0x3   :  { %755 = dma.done.wait [#allocation3], 16 }
   0x4   :  { %756 = vsyncadd [#allocation3], 4294967280 }
   0x5   :  { %20 = sfence }
   0x6   :  { %21 = vsyncpa [#allocation6], 0 }
   0x7   :  { %22 = vsyncpa [#allocation9], 0 }
   0x8   :  { %23 = vsyncpa [#allocation12], 0 }
   0x9   :  { %24 = vsyncpa [#allocation7], 0  ;;  %s42_s11 = sshll.u32 %s855_s2, 4  ;;  %s766_s12 = smov [#allocation8]   ;;  %s43_s11 = int_to_ptr.hbm [resolvable:$true] %s42_s11 }
   0xa   :  { %s44_s13 = sshll.u32 %s766_s12, 4  ;;  %s767_s14 = smov 384   ;;  %s45_s13 = int_to_ptr.vmem [resolvable:$true] %s44_s13 }
   0xb   :  { %s768_s0 = smov 24   ;;  %s68_s17 = sshll.u32 %s857_s4, 4  ;;  %s69_s17 = int_to_ptr.hbm [resolvable:$true] %s68_s17 }
   0xc   :  { %50 = dma.hbm_to_vmem [thread:$0]  %s43_s11, 768, %s45_s13, [#allocation9], %s767_s14, %s767_s14, %s768_s0  }
   0xd   :  { %s769_s18 = smov [#allocation11]   ;;  %s29_s22 = sshll.u32 %s854_s1, 4  ;;  %s30_s22 = int_to_ptr.hbm [resolvable:$true] %s29_s22 }
   0xe   :  { %s70_s19 = sshll.u32 %s769_s18, 4  ;;  %s770_s2 = smov 192   ;;  %s71_s19 = int_to_ptr.vmem [resolvable:$true] %s70_s19 }
   0xf   :  { %s771_s23 = smov 12   ;;  %s55_s26 = sshll.u32 %s856_s3, 4  ;;  %s56_s26 = int_to_ptr.hbm [resolvable:$true] %s55_s26 }
  0x10   :  { %76 = dma.hbm_to_vmem [thread:$0]  %s69_s17, 3072, %s71_s19, [#allocation12], %s770_s2, %s770_s2, %s771_s23  }
  0x11   :  { %s772_s27 = smov [#allocation5]   ;;  %s773_s4 = smov [#allocation10]  }
  0x12   :  { %s31_s28 = sshll.u32 %s772_s27, 4  ;;  %s57_s29 = sshll.u32 %s773_s4, 4  ;;  %s32_s28 = int_to_ptr.vmem [resolvable:$true] %s31_s28  ;;  %s58_s29 = int_to_ptr.vmem [resolvable:$true] %s57_s29 }
  0x13   :  { %37 = dma.hbm_to_vmem [thread:$0]  %s30_s22, 768, %s32_s28, [#allocation6], %s767_s14, %s767_s14, %s768_s0  }
  0x14   :  { %s84_s1 = sshll.u32 %s859_s6, 4  ;;  %s774_s10 = smov [#allocation13]   ;;  %s85_s1 = int_to_ptr.hbm [resolvable:$true] %s84_s1 }
  0x15   :  { %63 = dma.hbm_to_vmem [thread:$0]  %s56_s26, 3072, %s58_s29, [#allocation9], %s770_s2, %s770_s2, %s771_s23  }
  0x16   :  { %s86_s11 = sshll.u32 %s774_s10, 4  ;;  %s87_s11 = int_to_ptr.vmem [resolvable:$true] %s86_s11 }
  0x17   :  { %89 = dma.hbm_to_vmem [thread:$0]  %s85_s1, 48, %s87_s11, [#allocation12]  }
  0x18   :  { %757 = dma.done.wait [#allocation6], 768  }
  0x19   :  { %758 = vsyncadd [#allocation6], 4294966528 }
  0x1a   :  { %759 = dma.done.wait [#allocation9], 3840  }
  0x1b   :  { %760 = vsyncadd [#allocation9], 4294963456 }
  0x1c   :  { %761 = dma.done.wait [#allocation12], 3120  }
  0x1d   :  { %762 = vsyncadd [#allocation12], 4294964176  ;;  %v538_v0 = vld [vmem:[#allocation11 + $0xa8] sm:$0xf]  ;;  %v576_v1 = vld [vmem:[#allocation11 + $0xb0] sm:$0xf0] }
  0x1e   :  { %v575_v2 = vld [vmem:[#allocation11 + $0xac] sm:$0xf]  ;;  %v539_v3 = vor.u32 %v576_v1, %v538_v0  ;;  %v540_v4 = vld [vmem:[#allocation11 + $0xb4] sm:$0xf0]  ;;  %v526_v5 = vld [vmem:[#allocation11 + $0x90] sm:$0xf] }
  0x1f   :  { %v573_v6 = vld [vmem:[#allocation11 + $0x98] sm:$0xf0]  ;;  %v543_v7 = vor.u32 %v575_v2, %v540_v4  ;;  %v572_v8 = vld [vmem:[#allocation11 + $0x94] sm:$0xf]  ;;  %v528_v9 = vld [vmem:[#allocation11 + $0x9c] sm:$0xf0] }
  0x20   :  { %321 = vmatpush.bf16.msra.mxu0 %v539_v3  ;;  %v527_v10 = vor.u32 %v573_v6, %v526_v5  ;;  %v531_v11 = vor.u32 %v572_v8, %v528_v9  ;;  %v514_v12 = vld [vmem:[#allocation11 + $0x78] sm:$0xf]  ;;  %v570_v13 = vld [vmem:[#allocation11 + $0x80] sm:$0xf0]  ;;  %v569_v14 = vld [vmem:[#allocation11 + $0x7c] sm:$0xf] }
  0x21   :  { %334 = vmatpush.bf16.msra.mxu1 %v543_v7  ;;  %v516_v15 = vld [vmem:[#allocation11 + $0x84] sm:$0xf0]  ;;  %v546_v16 = vld [vmem:[#allocation11 + $0xb0] sm:$0xf]  ;;  %v515_v17 = vor.u32 %v570_v13, %v514_v12  ;;  %v577_v18 = vld [vmem:[#allocation11 + $0xb8] sm:$0xf0] }
  0x22   :  { %v519_v19 = vor.u32 %v569_v14, %v516_v15  ;;  %v502_v20 = vld [vmem:[#allocation11 + $0x60] sm:$0xf]  ;;  %v567_v21 = vld [vmem:[#allocation11 + $0x68] sm:$0xf0]  ;;  %v547_v22 = vor.u32 %v577_v18, %v546_v16  ;;  %v534_v23 = vld [vmem:[#allocation11 + $0x98] sm:$0xf] }
  0x23   :  { %v566_v24 = vld [vmem:[#allocation11 + $0x64] sm:$0xf]  ;;  %v504_v25 = vld [vmem:[#allocation11 + $0x6c] sm:$0xf0]  ;;  %v503_v28 = vor.u32 %v567_v21, %v502_v20  ;;  %v522_v29 = vld [vmem:[#allocation11 + $0x80] sm:$0xf] }
  0x24   :  { %322 = vmatpush.bf16.msra.mxu0 %v527_v10  ;;  %v574_v26 = vld [vmem:[#allocation11 + $0xa0] sm:$0xf0]  ;;  %347 = vmatpush.bf16.msra.mxu2 %v547_v22  ;;  %v571_v30 = vld [vmem:[#allocation11 + $0x88] sm:$0xf0]  ;;  %v507_v31 = vor.u32 %v566_v24, %v504_v25  ;;  %v490_v32 = vld [vmem:[#allocation11 + $0x48] sm:$0xf] }
  0x25   :  { %335 = vmatpush.bf16.msra.mxu1 %v531_v11  ;;  %v535_v27 = vor.u32 %v574_v26, %v534_v23  ;;  %v564_v33 = vld [vmem:[#allocation11 + $0x50] sm:$0xf0]  ;;  %v563_v34 = vld [vmem:[#allocation11 + $0x4c] sm:$0xf]  ;;  %v492_v35 = vld [vmem:[#allocation11 + $0x54] sm:$0xf0]  ;;  %v523_v37 = vor.u32 %v571_v30, %v522_v29 }
  0x26   :  { %v116_v36 = vld [vmem:[%s860_s7] sm:$0x1]  ;;  %v491_v38 = vor.u32 %v564_v33, %v490_v32  ;;  %v510_v39 = vld [vmem:[#allocation11 + $0x68] sm:$0xf]  ;;  %v568_v40 = vld [vmem:[#allocation11 + $0x70] sm:$0xf0]  ;;  %v495_v41 = vor.u32 %v563_v34, %v492_v35 }
  0x27   :  { %117 = vst [vmem:[#allocation2] sm:$0x1] %v116_v36  ;;  %v478_v42 = vld [vmem:[#allocation11 + $0x30] sm:$0xf]  ;;  %v561_v43 = vld [vmem:[#allocation11 + $0x38] sm:$0xf0]  ;;  %v511_v46 = vor.u32 %v568_v40, %v510_v39 }
  0x28   :  { %323 = vmatpush.bf16.msra.mxu0 %v515_v17  ;;  %348 = vmatpush.bf16.msra.mxu2 %v535_v27  ;;  %v560_v44 = vld [vmem:[#allocation11 + $0x34] sm:$0xf]  ;;  %v480_v45 = vld [vmem:[#allocation11 + $0x3c] sm:$0xf0]  ;;  %v479_v47 = vor.u32 %v561_v43, %v478_v42  ;;  %v498_v48 = vld [vmem:[#allocation11 + $0x50] sm:$0xf] }
  0x29   :  { %336 = vmatpush.bf16.msra.mxu1 %v519_v19  ;;  %v565_v49 = vld [vmem:[#allocation11 + $0x58] sm:$0xf0]  ;;  %v483_v50 = vor.u32 %v560_v44, %v480_v45  ;;  %v466_v51 = vld [vmem:[#allocation11 + $0x18] sm:$0xf]  ;;  %v558_v52 = vld [vmem:[#allocation11 + $0x20] sm:$0xf0] }
  0x2a   :  { %v557_v53 = vld [vmem:[#allocation11 + $0x1c] sm:$0xf]  ;;  %v468_v54 = vld [vmem:[#allocation11 + $0x24] sm:$0xf0]  ;;  %v499_v55 = vor.u32 %v565_v49, %v498_v48  ;;  %v467_v56 = vor.u32 %v558_v52, %v466_v51  ;;  %v486_v57 = vld [vmem:[#allocation11 + $0x38] sm:$0xf] }
  0x2b   :  { %v562_v58 = vld [vmem:[#allocation11 + $0x40] sm:$0xf0]  ;;  %v471_v59 = vor.u32 %v557_v53, %v468_v54  ;;  %v454_v60 = vld [vmem:[#allocation11] sm:$0xf]  ;;  %v555_v61 = vld [vmem:[#allocation11 + $0x8] sm:$0xf0] }
  0x2c   :  { %324 = vmatpush.bf16.msra.mxu0 %v503_v28  ;;  %349 = vmatpush.bf16.msra.mxu2 %v523_v37  ;;  %v554_v62 = vld [vmem:[#allocation11 + $0x4] sm:$0xf]  ;;  %v456_v63 = vld [vmem:[#allocation11 + $0xc] sm:$0xf0]  ;;  %v487_v0 = vor.u32 %v562_v58, %v486_v57  ;;  %v455_v1 = vor.u32 %v555_v61, %v454_v60  ;;  %v474_v3 = vld [vmem:[#allocation11 + $0x20] sm:$0xf] }
  0x2d   :  { %337 = vmatpush.bf16.msra.mxu1 %v507_v31  ;;  %v559_v4 = vld [vmem:[#allocation11 + $0x28] sm:$0xf0]  ;;  %v459_v5 = vor.u32 %v554_v62, %v456_v63  ;;  %v462_v8 = vld [vmem:[#allocation11 + $0x8] sm:$0xf]  ;;  %v556_v9 = vld [vmem:[#allocation11 + $0x10] sm:$0xf0] }
  0x2e   :  { %v842_v2 = vld [vmem:[#allocation2] sm:$0x1]  ;;  %v475_v7 = vor.u32 %v559_v4, %v474_v3  ;;  %v463_v10 = vor.u32 %v556_v9, %v462_v8  ;;  %s119_s7 = sld [smem:[#allocation4]]  ;;  %v131_v15 = vld [vmem:[#allocation13] sm:$0x7]  ;;  %s421_s26 = sshll.u32 %s861_s8, 4  ;;  %s422_s26 = int_to_ptr.hbm [resolvable:$true] %s421_s26 }
  0x2f   :  { %v153_v6 = vpack.c.bf16 %v842_v2, %v842_v2  ;;  %s444_s12 = sld [smem:[#allocation4 + $0x1]]  ;;  %v130_v14 = vld [vmem:[%s858_s5] sm:$0x7]  ;;  %v315_v17 = vperm.slane %v131_v15, 0  ;;  %v316_v18 = vperm.slane %v131_v15, 1  ;;  %v317_v40 = vperm.slane %v131_v15, 2 }
  0x30   :  { %325 = vmatpush.bf16.msra.mxu0 %v491_v38  ;;  %350 = vmatpush.bf16.msra.mxu2 %v511_v46  ;;  %s775_s5 = smov [#allocation14]  }
  0x31   :  { %338 = vmatpush.bf16.msra.mxu1 %v495_v41  ;;  %s419_s23 = sshll.u32 %s775_s5, 4  ;;  %s420_s23 = int_to_ptr.vmem [resolvable:$true] %s419_s23 }
  0x34   :  { %326 = vmatpush.bf16.msra.mxu0 %v479_v47  ;;  %351 = vmatpush.bf16.msra.mxu2 %v499_v55  ;;  %p120_p0 = scmp.gt.s32.totalorder %s119_s7, 0  ;;  %p439_p2 = scmp.lt.s32.totalorder %s119_s7, 15 }
  0x35   :  { %339 = vmatpush.bf16.msra.mxu1 %v483_v50  ;;  %p126_p1 = scmp.gt.s32.totalorder %s444_s12, 0  ;;  %p445_p3 = scmp.lt.s32.totalorder %s444_s12, 15 }
  0x36   :  { %s863_s7 = smov (!%p120_p0, %s119_s7), 0 }
  0x37   :  { %s865_s12 = smov (!%p126_p1, %s444_s12), 0  ;;  %s867_s7 = smov (!%p439_p2, %s863_s7), 15 }
  0x38   :  { %327 = vmatpush.bf16.msra.mxu0 %v467_v56  ;;  %352 = vmatpush.bf16.msra.mxu2 %v487_v0  ;;  %s869_s12 = smov (!%p445_p3, %s865_s12), 15  ;;  %s133_s13 = sshra.s32 %s867_s7, 3 }
  0x39   :  { %340 = vmatpush.bf16.msra.mxu1 %v471_v59  ;;  %s142_s14 = sshra.s32 %s869_s12, 3  ;;  %s450_s0 = smul.u32 24, %s133_s13 }
  0x3a   :  { %s451_s15 = smul.u32 24, %s142_s14  ;;  %s136_s16 = sand.u32 7, %s867_s7 }
  0x3b   :  { %s145_s17 = sand.u32 7, %s869_s12  ;;  %s139_s18 = sadd.s32 %s450_s0, %s136_s16 }
  0x3c   :  { %328 = vmatpush.bf16.msra.mxu0 %v455_v1  ;;  %353 = vmatpush.bf16.msra.mxu2 %v475_v7  ;;  %s148_s19 = sadd.s32 %s451_s15, %s145_s17  ;;  %s140_s20 = scalar_lea.vmem [#allocation5], %s139_s18 }
  0x3d   :  { %341 = vmatpush.bf16.msra.mxu1 %v459_v5  ;;  %v141_v11 = vld [vmem:[%s140_s20] ss:$8 sm:$0x7]  ;;  %s149_s21 = scalar_lea.vmem [#allocation8], %s148_s19 }
  0x3e   :  { %v150_v12 = vld [vmem:[%s149_s21] ss:$8 sm:$0x7] }
  0x3f   :  { %329 = vmatmul.bf16.vlgmr.msra.gmra.mxu0 %v153_v6  ;;  %v151_v13 = vadd.f32 %v150_v12, %v141_v11 }
  0x40   :  { %342 = vmatmul.bf16.vlgmr.msra.gmra.mxu1 %v153_v6  ;;  %354 = vmatpush.bf16.msra.mxu2 %v463_v10 }
  0x41   :  { %v152_v16 = vadd.f32 %v151_v13, %v130_v14 }
  0x43   :  { %355 = vmatmul.bf16.vlgmr.msra.gmra.mxu2 %v153_v6  ;;  %v381_v20 = vrot.slane %v152_v16, 1  ;;  %v404_v51 = vrot.slane %v152_v16, 2 }
  0xbc   :  { %v330_v19 = vpop.f32.mrf.mxu0 }
  0xbd   :  { %v331_v21 = vadd.f32 %v330_v19, %v315_v17  ;;  %v343_v22 = vpop.f32.mrf.mxu1 }
  0xbe   :  { %v344_v23 = vadd.f32 %v343_v22, %v316_v18 }
  0xbf   :  { %v360_v24 = vadd.f32 %v331_v21, %v152_v16 }
  0xc0   :  { %v383_v25 = vadd.f32 %v381_v20, %v344_v23 }
  0xc1   :  { %v548_v26 = vmul.f32 -1.442695, %v360_v24 }
  0xc2   :  { %v549_v27 = vmul.f32 -1.442695, %v383_v25 }
  0xc3   :  { %589 = vpow2.f32 %v548_v26 }
  0xc4   :  { %591 = vpow2.f32 %v549_v27  ;;  %v332_v28 = vpop.f32.mrf.mxu0 }
  0xc5   :  { %v345_v29 = vpop.f32.mrf.mxu1 }
  0xc6   :  { %v356_v31 = vpop.f32.mrf.mxu2 }
  0xc7   :  { %v357_v47 = vadd.f32 %v356_v31, %v317_v40 }
  0xc9   :  { %v590_v30 = vpop.eup %589 }
  0xca   :  { %v592_v32 = vpop.eup %591  ;;  %v364_v33 = vadd.f32 1.0, %v590_v30 }
  0xcb   :  { %v387_v34 = vadd.f32 1.0, %v592_v32 }
  0xcc   :  { %593 = vrcp.f32 %v364_v33  ;;  %v376_v43 = vand.u32 2147483648, %v364_v33  ;;  %v374_v45 = vand.u32 2147483647, %v364_v33  ;;  %vm370_vm1 = vweird.f32 %v364_v33 }
  0xcd   :  { %595 = vrcp.f32 %v387_v34  ;;  %vm393_vm4 = vweird.f32 %v387_v34  ;;  %v399_v55 = vand.u32 2147483648, %v387_v34  ;;  %v397_v56 = vand.u32 2147483647, %v387_v34 }
  0xce   :  { %v358_v35 = vpop.f32.mrf.mxu2  ;;  %v377_v49 = vor.u32 1.1754944e-38, %v376_v43  ;;  %vm375_vm3 = vcmp.eq.f32.partialorder %v374_v45, 8.507059e+37 }
  0xcf   :  { %v400_v59 = vor.u32 1.1754944e-38, %v399_v55  ;;  %vm398_vm7 = vcmp.eq.f32.partialorder %v397_v56, 8.507059e+37 }
  0xd2   :  { %v594_v36 = vpop.eup %593 }
  0xd3   :  { %v596_v37 = vpop.eup %595  ;;  %v366_v38 = vmul.f32 %v594_v36, %v364_v33  ;;  %vm371_vm0 = vweird.f32 %v594_v36 }
  0xd4   :  { %v389_v39 = vmul.f32 %v596_v37, %v387_v34  ;;  %vm372_vm2 = vmor %vm370_vm1, %vm371_vm0  ;;  %vm394_vm5 = vweird.f32 %v596_v37 }
  0xd5   :  { %v367_v41 = vsub.f32 1.0, %v366_v38  ;;  %vm395_vm6 = vmor %vm393_vm4, %vm394_vm5 }
  0xd6   :  { %v390_v42 = vsub.f32 1.0, %v389_v39 }
  0xd7   :  { %v368_v44 = vmul.f32 %v594_v36, %v367_v41 }
  0xd8   :  { %v391_v46 = vmul.f32 %v596_v37, %v390_v42 }
  0xd9   :  { %v369_v48 = vadd.f32 %v594_v36, %v368_v44 }
  0xda   :  { %v392_v53 = vadd.f32 %v596_v37, %v391_v46 }
  0xdb   :  { %v373_v50 = vsel %vm372_vm2, %v594_v36, %v369_v48 }
  0xdc   :  { %v378_v52 = vsel %vm375_vm3, %v377_v49, %v373_v50  ;;  %v396_v58 = vsel %vm395_vm6, %v596_v37, %v392_v53 }
  0xdd   :  { %v403_v54 = vmul.f32 %v378_v52, %v357_v47  ;;  %v401_v60 = vsel %vm398_vm7, %v400_v59, %v396_v58 }
  0xde   :  { %v408_v61 = vsub.f32 1.0, %v401_v60  ;;  %v410_v0 = vmul.f32 %v401_v60, %v842_v2 }
  0xdf   :  { %v406_v57 = vadd.f32 %v404_v51, %v403_v54 }
  0xe1   :  { %597 = vtanh.f32 %v406_v57 }
  0xe7   :  { %v598_v62 = vpop.eup %597 }
  0xe8   :  { %v409_v63 = vmul.f32 %v598_v62, %v408_v61 }
  0xea   :  { %v411_v1 = vadd.f32 %v410_v0, %v409_v63 }
  0xec   :  { %412 = vst [vmem:[#allocation2] sm:$0x1] %v411_v1 }
  0xed   :  { %413 = vst [vmem:[#allocation14] sm:$0x1] %v411_v1 }
  0xee   :  { %424 = dma.vmem_to_hbm [thread:$0]  %s420_s23, 16, %s422_s26, [#allocation7]  }
  0xef   :  { %763 = dma.done.wait [#allocation7], 16  }
  0xf0   :  { %764 = vsyncadd [#allocation7], 4294967280 }
  0xf1   :  { %429 = vsyncpa [#allocation6], 1 }
  0xf2   :  { %430 = vsyncpa [#allocation9], 1 }
  0xf3   :  { %431 = vsyncpa [#allocation12], 1 }
  0xf4   :  { %432 = vsyncpa [#allocation7], 1 }

</bundles_post_ra>
